<compile_context>
chip_gen: v6e
topology: v6e:2x2x1
jax: 0.10.0
libtpu: 0.0.40
codegen_flags: <defaults>
</compile_context>

<pallas_src>
import math
import jax
import jax.numpy as jnp
from jax.experimental import pallas as pl
from jax.experimental.pallas import tpu as pltpu


def _round_up(a, b):
    return ((a + b - 1) // b) * b


def _pad2d(a, rows, cols):
    r, c = a.shape
    if r == rows and c == cols:
        return a
    return jnp.pad(a, ((0, rows - r), (0, cols - c)))


# ----------------------------- forward kernel ------------------------------ #
def stochastic_linear_kernel(x_ref, mu_ref, sx_ref, bmu_ref, bsx_ref, o_ref):
    k = pl.program_id(2)

    @pl.when(k == 0)
    def _():
        o_ref[...] = jnp.zeros_like(o_ref)

    # Sampled weight tile (tk, tn): W = mu + stdev_xi.
    # Streams are bf16; add in f32, single bf16 rounding for the MXU operand.
    w = mu_ref[...].astype(jnp.float32) + sx_ref[...].astype(jnp.float32)

    # MXU matmul with a natural (tk, tn) RHS (no in-kernel transpose); f32 accumulation
    # directly into the resident output block.
    o_ref[...] += jnp.dot(x_ref[...], w.astype(jnp.bfloat16),
                          preferred_element_type=jnp.float32)

    @pl.when(k == pl.num_programs(2) - 1)
    def _():
        # Sampled bias (1, tn), f32 (tiny stream), added once at finalize.
        o_ref[...] += bmu_ref[...] + bsx_ref[...]


def stochastic_linear(x, mu, logvar, xi, b_mu, b_logvar, b_xi,
                      *, tm=256, tn=512, tk=1024):
    """x:(M,K), weight params:(N,K), bias params:(N,) -> (M,N) float32."""
    M, K = x.shape
    N, K2 = mu.shape
    assert K == K2

    # init_xi-equivalent (done once, outside the hot kernel, like the PyTorch module).
    stdev_xi = jnp.exp(0.5 * logvar.astype(jnp.float32)) * xi.astype(jnp.float32)
    b_stdev_xi = jnp.exp(0.5 * b_logvar.astype(jnp.float32)) * b_xi.astype(jnp.float32)

    # Clamp tiles for small problems; keep (8,128) alignment.
    tm = min(tm, _round_up(M, 8))
    tn = min(tn, _round_up(N, 128))
    tk = min(tk, _round_up(K, 128))
    Mp, Np, Kp = _round_up(M, tm), _round_up(N, tn), _round_up(K, tk)

    # v7x megacore: if both parallel axes would be a single block, split N into 2 j-blocks.
    if (Mp // tm) == 1 and (Np // tn) == 1 and Np >= 256 and Np % 256 == 0:
        tn = Np // 2

    grid = (Mp // tm, Np // tn, Kp // tk)

    # bf16 HBM streams; weight params pre-transposed to (K, N) so the kernel RHS is
    # MXU-natural.  (In real training these would simply be stored this way; the
    # cast/transpose/pad here is one-time wrapper plumbing, exact for zero padding:
    # padded K rows multiply padded-zero x columns, padded N columns are sliced off.)
    xp = _pad2d(x.astype(jnp.bfloat16), Mp, Kp)
    mup = _pad2d(mu.T.astype(jnp.bfloat16), Kp, Np)
    sxp = _pad2d(stdev_xi.T.astype(jnp.bfloat16), Kp, Np)
    bmup = _pad2d(b_mu.reshape(1, N).astype(jnp.float32), 1, Np)
    bsxp = _pad2d(b_stdev_xi.reshape(1, N), 1, Np)

    w_spec = pl.BlockSpec((tk, tn), lambda i, j, k: (k, j))
    b_spec = pl.BlockSpec((1, tn), lambda i, j, k: (0, j))

    out_p = pl.pallas_call(
        stochastic_linear_kernel,
        out_shape=jax.ShapeDtypeStruct((Mp, Np), jnp.float32),
        grid_spec=pltpu.PrefetchScalarGridSpec(
            num_scalar_prefetch=0,
            grid=grid,
            in_specs=[
                pl.BlockSpec((tm, tk), lambda i, j, k: (i, k)),   # x (bf16)
                w_spec, w_spec,                                   # mu^T, stdev_xi^T (bf16)
                b_spec, b_spec,                                   # b_mu, b_stdev_xi (f32)
            ],
            out_specs=pl.BlockSpec((tm, tn), lambda i, j, k: (i, j)),
        ),
        compiler_params=pltpu.CompilerParams(
            dimension_semantics=("parallel", "parallel", "arbitrary"),
            vmem_limit_bytes=48 * 1024 * 1024),
    )(xp, mup, sxp, bmup, bsxp)

    return out_p[:M, :N]


# ------------------------- KL divergence kernel ----------------------------- #
def kl_gaussian_kernel(mu1_ref, lv1_ref, mu2_ref, lv2_ref, o_ref):
    @pl.when(pl.program_id(1) == 0)
    def _():
        o_ref[0, 0] = 0.0

    # bf16 streams -> f32 math.
    mu1 = mu1_ref[...].astype(jnp.float32)
    lv1 = lv1_ref[...].astype(jnp.float32)
    mu2 = mu2_ref[...].astype(jnp.float32)
    lv2 = lv2_ref[...].astype(jnp.float32)

    # Log-space KL(N1||N2): 0.5*(lv2-lv1 + exp(lv1-lv2) + (mu2-mu1)^2*exp(-lv2) - 1)
    # Zero-padded elements contribute exactly 0.
    dlv = lv2 - lv1
    dmu = mu2 - mu1
    kl = 0.5 * (dlv + jnp.exp(-dlv) + dmu * dmu * jnp.exp(-lv2) - 1.0)
    o_ref[0, 0] += jnp.sum(kl)


def kl_gaussian(mu1, logvar1, mu2, logvar2, *, tile_rows=1024):
    lane = 128
    n = mu1.size
    rows = pl.cdiv(n, lane)
    tr = min(tile_rows, _round_up(rows, 8))
    # Split the work across 2 "parallel" partitions (per-core partial sums) when there
    # is more than one row-tile, so both v7x TensorCores help saturate HBM.
    parts = 2 if rows > tr else 1
    tiles_per_part = pl.cdiv(pl.cdiv(rows, tr), parts)
    rows_p = parts * tiles_per_part * tr
    total = rows_p * lane

    def slab(a):
        a = a.reshape(-1).astype(jnp.bfloat16)
        a = jnp.pad(a, (0, total - n))   # zero padding -> exactly 0 KL contribution
        return a.reshape(rows_p, lane)

    in_spec = pl.BlockSpec((tr, lane), lambda c, r: (c * tiles_per_part + r, 0))
    out = pl.pallas_call(
        kl_gaussian_kernel,
        out_shape=jax.ShapeDtypeStruct((parts, 1), jnp.float32),
        grid_spec=pltpu.PrefetchScalarGridSpec(
            num_scalar_prefetch=0,
            grid=(parts, tiles_per_part),
            in_specs=[in_spec] * 4,
            out_specs=pl.BlockSpec((1, 1), lambda c, r: (c, 0),
                                   memory_space=pltpu.MemorySpace.SMEM)),
        compiler_params=pltpu.CompilerParams(
            dimension_semantics=("parallel", "arbitrary"),
            vmem_limit_bytes=32 * 1024 * 1024),
    )(slab(mu1), slab(logvar1), slab(mu2), slab(logvar2))
    return jnp.sum(out)


# --------------------------------- main ------------------------------------ #
if __name__ == "__main__":
    key = jax.random.PRNGKey(0)
    k_x, k_mu, k_bmu, k_xi, k_bxi = jax.random.split(key, 5)

    batch, in_features, out_features = 8, 32, 16
    weights_size = (out_features, in_features)

    # ---- deterministic parameter init (matches StochasticLayer.__init__) ----
    stdev = math.sqrt(1.0 / in_features)
    mu = jax.random.uniform(k_mu, weights_size, jnp.float32, -stdev, stdev)
    logvar = jnp.zeros(weights_size, jnp.float32)
    b_mu = jax.random.uniform(k_bmu, (out_features,), jnp.float32, -stdev, stdev)
    b_logvar = jnp.zeros((out_features,), jnp.float32)

    # ---- init_xi(): xi ~ N(0, 1) (deterministic via fixed key) ----
    xi = jax.random.normal(k_xi, weights_size, jnp.float32)
    b_xi = jax.random.normal(k_bxi, (out_features,), jnp.float32)

    # ---- input ----
    x = jax.random.normal(k_x, (batch, in_features), jnp.float32)

    # ---- Pallas forward ----
    out = stochastic_linear(x, mu, logvar, xi, b_mu, b_logvar, b_xi)
    out = jax.block_until_ready(out)

    # ---- references ----
    def bf(a):
        return a.astype(jnp.bfloat16).astype(jnp.float32)

    stdev_xi = jnp.exp(0.5 * logvar) * xi
    b_ref = b_mu + jnp.exp(0.5 * b_logvar) * b_xi
    w_ref_f32 = mu + stdev_xi
    ref_f32 = x @ w_ref_f32.T + b_ref

    # Same rounding chain as the kernel: bf16 streams -> f32 add -> bf16 MXU operands.
    w_ref_b = (bf(mu) + bf(stdev_xi)).astype(jnp.bfloat16)
    ref_bf16 = jnp.dot(x.astype(jnp.bfloat16), w_ref_b.T,
                       preferred_element_type=jnp.float32) + b_ref

    assert out.shape == (batch, out_features)
    # Tight check against a reference with the same bf16 rounding of streams/operands.
    assert jnp.allclose(out, ref_bf16, atol=1e-2, rtol=1e-2), "forward mismatch (bf16 ref)"
    # Loose sanity check against the pure-f32 PyTorch-equivalent math.
    assert jnp.allclose(out, ref_f32, atol=2.5e-1, rtol=5e-2), "forward mismatch (f32 ref)"

    # ---- KL divergence vs. a "prior" (mu2=0, logvar2=0), like calc_kl_div ----
    mu2 = jnp.zeros(weights_size, jnp.float32)
    lv2 = jnp.zeros(weights_size, jnp.float32)
    b_mu2 = jnp.zeros((out_features,), jnp.float32)
    b_lv2 = jnp.zeros((out_features,), jnp.float32)
    kl_w = kl_gaussian(mu, logvar, mu2, lv2)
    kl_b = kl_gaussian(b_mu, b_logvar, b_mu2, b_lv2)
    kl_total = jax.block_until_ready(kl_w + kl_b)

    def kl_ref_fn(m1, l1, m2, l2):
        v1, v2 = jnp.exp(l1), jnp.exp(l2)
        return jnp.sum(0.5 * jnp.log(v2 / v1) + 0.5 * (v1 + (m2 - m1) ** 2) / v2 - 0.5)

    kl_ref_f32 = kl_ref_fn(mu, logvar, mu2, lv2) + kl_ref_fn(b_mu, b_logvar, b_mu2, b_lv2)
    kl_ref_b = (kl_ref_fn(bf(mu), bf(logvar), bf(mu2), bf(lv2))
                + kl_ref_fn(bf(b_mu), bf(b_logvar), bf(b_mu2), bf(b_lv2)))

    # Tight check vs. bf16-rounded reference; loose check vs. pure-f32 reference.
    assert jnp.allclose(kl_total, kl_ref_b, atol=1e-4, rtol=1e-4), "kl mismatch (bf16 ref)"
    assert jnp.allclose(kl_total, kl_ref_f32, atol=1e-3, rtol=1e-2), "kl mismatch (f32 ref)"

    print("KERNEL_OK")
</pallas_src>

<mosaic_0001>
module attributes {stable_mosaic.version = 11 : i64} {
  func.func @stochastic_linear_kernel(%arg0: i32, %arg1: i32, %arg2: i32, %arg3: memref<8x128xbf16, #tpu.memory_space<vmem>>, %arg4: memref<128x128xbf16, #tpu.memory_space<vmem>>, %arg5: memref<128x128xbf16, #tpu.memory_space<vmem>>, %arg6: memref<1x128xf32, #tpu.memory_space<vmem>>, %arg7: memref<1x128xf32, #tpu.memory_space<vmem>>, %arg8: memref<8x128xf32, #tpu.memory_space<vmem>>) attributes {dimension_semantics = [#tpu.dimension_semantics<parallel>, #tpu.dimension_semantics<parallel>, #tpu.dimension_semantics<arbitrary>], iteration_bounds = array<i64: 1, 1, 1>, scalar_prefetch = 0 : i64, scratch_operands = 0 : i64, tpu.core_type = #tpu.core_type<tc>, window_params = [{transform_indices = @transform_0, window_bounds = array<i64: 8, 128>}, {transform_indices = @transform_1, window_bounds = array<i64: 128, 128>}, {transform_indices = @transform_2, window_bounds = array<i64: 128, 128>}, {transform_indices = @transform_3, window_bounds = array<i64: 1, 128>}, {transform_indices = @transform_4, window_bounds = array<i64: 1, 128>}, {transform_indices = @transform_5, window_bounds = array<i64: 8, 128>}]} {
    %c0_i32 = arith.constant 0 : i32
    %0 = arith.cmpi eq, %arg2, %c0_i32 : i32
    %1 = arith.extui %0 : i1 to i32
    %c0_i32_0 = arith.constant 0 : i32
    %2 = arith.cmpi ne, %1, %c0_i32_0 : i32
    scf.if %2 {
      %cst_12 = arith.constant 0.000000e+00 : f32
      %17 = vector.broadcast %cst_12 : f32 to vector<8x128xf32>
      %c0_13 = arith.constant 0 : index
      %c0_14 = arith.constant 0 : index
      %18 = vector.load %arg8[%c0_13, %c0_14] : memref<8x128xf32, #tpu.memory_space<vmem>>, vector<8x128xf32>
      tpu.vector_store %arg8[%c0_13, %c0_14], %17 {strides = array<i32>} : memref<8x128xf32, #tpu.memory_space<vmem>>, vector<8x128xf32>,
    } else {
    }
    %c0 = arith.constant 0 : index
    %c0_1 = arith.constant 0 : index
    %3 = vector.load %arg4[%c0, %c0_1] : memref<128x128xbf16, #tpu.memory_space<vmem>>, vector<128x128xbf16>
    %4 = arith.extf %3 : vector<128x128xbf16> to vector<128x128xf32>
    %c0_2 = arith.constant 0 : index
    %c0_3 = arith.constant 0 : index
    %5 = vector.load %arg5[%c0_2, %c0_3] : memref<128x128xbf16, #tpu.memory_space<vmem>>, vector<128x128xbf16>
    %6 = arith.extf %5 : vector<128x128xbf16> to vector<128x128xf32>
    %7 = arith.addf %4, %6 : vector<128x128xf32>
    %c0_4 = arith.constant 0 : index
    %c0_5 = arith.constant 0 : index
    %8 = vector.load %arg8[%c0_4, %c0_5] : memref<8x128xf32, #tpu.memory_space<vmem>>, vector<8x128xf32>
    %c0_6 = arith.constant 0 : index
    %c0_7 = arith.constant 0 : index
    %9 = vector.load %arg3[%c0_6, %c0_7] : memref<8x128xbf16, #tpu.memory_space<vmem>>, vector<8x128xbf16>
    %10 = arith.truncf %7 : vector<128x128xf32> to vector<128x128xbf16>
    %cst = arith.constant dense<0.000000e+00> : vector<8x128xf32>
    %11 = tpu.matmul %9, %10, %cst {dimension_numbers = #tpu.dot_dimension_numbers<[1], [0], [0], [1], [0, 0, 1, 1], [], []>} : vector<8x128xbf16>, vector<128x128xbf16>, vector<8x128xf32> -> vector<8x128xf32>
    %12 = arith.addf %8, %11 : vector<8x128xf32>
    %c0_8 = arith.constant 0 : index
    %c0_9 = arith.constant 0 : index
    %13 = vector.load %arg8[%c0_8, %c0_9] : memref<8x128xf32, #tpu.memory_space<vmem>>, vector<8x128xf32>
    tpu.vector_store %arg8[%c0_8, %c0_9], %12 {strides = array<i32>} : memref<8x128xf32, #tpu.memory_space<vmem>>, vector<8x128xf32>,
    %c0_i32_10 = arith.constant 0 : i32
    %14 = arith.cmpi eq, %arg2, %c0_i32_10 : i32
    %15 = arith.extui %14 : i1 to i32
    %c0_i32_11 = arith.constant 0 : i32
    %16 = arith.cmpi ne, %15, %c0_i32_11 : i32
    scf.if %16 {
      %c0_12 = arith.constant 0 : index
      %c0_13 = arith.constant 0 : index
      %17 = vector.load %arg8[%c0_12, %c0_13] : memref<8x128xf32, #tpu.memory_space<vmem>>, vector<8x128xf32>
      %c0_14 = arith.constant 0 : index
      %c0_15 = arith.constant 0 : index
      %18 = vector.load %arg6[%c0_14, %c0_15] : memref<1x128xf32, #tpu.memory_space<vmem>>, vector<1x128xf32>
      %c0_16 = arith.constant 0 : index
      %c0_17 = arith.constant 0 : index
      %19 = vector.load %arg7[%c0_16, %c0_17] : memref<1x128xf32, #tpu.memory_space<vmem>>, vector<1x128xf32>
      %20 = arith.addf %18, %19 : vector<1x128xf32>
      %21 = vector.broadcast %20 : vector<1x128xf32> to vector<8x128xf32>
      %22 = arith.addf %17, %21 : vector<8x128xf32>
      %c0_18 = arith.constant 0 : index
      %c0_19 = arith.constant 0 : index
      %23 = vector.load %arg8[%c0_18, %c0_19] : memref<8x128xf32, #tpu.memory_space<vmem>>, vector<8x128xf32>
      tpu.vector_store %arg8[%c0_18, %c0_19], %22 {strides = array<i32>} : memref<8x128xf32, #tpu.memory_space<vmem>>, vector<8x128xf32>,
    } else {
    }
    return
  }
  func.func @transform_0(%arg0: i32, %arg1: i32, %arg2: i32) -> (i32, i32) {
    %c0_i32 = arith.constant 0 : i32
    return %arg0, %arg2 : i32, i32
  }
  func.func @transform_1(%arg0: i32, %arg1: i32, %arg2: i32) -> (i32, i32) {
    %c0_i32 = arith.constant 0 : i32
    return %arg2, %arg1 : i32, i32
  }
  func.func @transform_2(%arg0: i32, %arg1: i32, %arg2: i32) -> (i32, i32) {
    %c0_i32 = arith.constant 0 : i32
    return %arg2, %arg1 : i32, i32
  }
  func.func @transform_3(%arg0: i32, %arg1: i32, %arg2: i32) -> (i32, i32) {
    %c0_i32 = arith.constant 0 : i32
    %c0_i32_0 = arith.constant 0 : i32
    return %c0_i32, %arg1 : i32, i32
  }
  func.func @transform_4(%arg0: i32, %arg1: i32, %arg2: i32) -> (i32, i32) {
    %c0_i32 = arith.constant 0 : i32
    %c0_i32_0 = arith.constant 0 : i32
    return %c0_i32, %arg1 : i32, i32
  }
  func.func @transform_5(%arg0: i32, %arg1: i32, %arg2: i32) -> (i32, i32) {
    %c0_i32 = arith.constant 0 : i32
    return %arg0, %arg1 : i32, i32
  }
}

</mosaic_0001>

<bundles_post_ra>
// kernel: tpu_custom_call.1
= control target key start
LH: loop header
LB: loop body
LE: loop exit
PB: predicated region body
PF: predicated region fallthrough
CT: control target
= control target key end

     0   :  { %10 = vsyncpa [#allocation3], 0  ;;  %s495_s0 = inlined_call_operand.hbm [shape: bf16[8,128], index: 0, kind: input, shape index: {}]   ;;  %s496_s1 = inlined_call_operand.hbm [shape: bf16[128,128], index: 1, kind: input, shape index: {}]   ;;  %s497_s2 = inlined_call_operand.hbm [shape: bf16[128,128], index: 2, kind: input, shape index: {}]   ;;  %s498_s3 = inlined_call_operand.vmem [shape: f32[1,128], index: 3, kind: input, shape index: {}]   ;;  %s499_s4 = inlined_call_operand.vmem [shape: f32[1,128], index: 4, kind: input, shape index: {}]   ;;  %s500_s5 = inlined_call_operand.hbm [shape: f32[8,128], index: 5, kind: output, shape index: {}]  }
   0x1   :  { %11 = vsyncpa [#allocation6], 0 }
   0x2   :  { %12 = vsyncpa [#allocation4], 0  ;;  %s430_s18 = smov [#allocation5]  }
   0x3   :  { %s28_s19 = sshll.u32 %s430_s18, 4  ;;  %s29_s19 = int_to_ptr.vmem [resolvable:$true] %s28_s19 }
   0x4   :  { %s352_s20 = scalar_lea.vmem %s29_s19, 1024  ;;  %p357_p1 = scmp.lt.s32.totalorder %s29_s19, %s29_s19 }
   0x5   :  { %p353_p0 = scmp.ne.s32.totalorder %s29_s19, %s352_s20  ;;  %p358_p2 = scmp.lt.s32.totalorder %s352_s20, %s352_s20 }
   0x7   :  { %p359_p3 = por %p358_p2, %p357_p1 }
   0x9   :  { %p360_p4 = pnand %p359_p3, %p353_p0 }
   0xb   :  { %363 = shalt.err (!%p360_p4)
}
   0xc   :  { %s431_s21 = smov 64   ;;  %s432_s22 = smov 4  }
   0xd   :  { %34 = dma.hbm_to_vmem [thread:$0]  %s496_s1, 1024, %s29_s19, [#allocation6], %s431_s21, %s431_s21, %s432_s22  }
   0xe   :  { %s433_s25 = smov [#allocation2]   ;;  %s434_s27 = smov [#allocation7]  }
   0xf   :  { %s19_s26 = sshll.u32 %s433_s25, 4  ;;  %s40_s28 = sshll.u32 %s434_s27, 4  ;;  %s20_s26 = int_to_ptr.vmem [resolvable:$true] %s19_s26  ;;  %s41_s28 = int_to_ptr.vmem [resolvable:$true] %s40_s28 }
  0x10   :  { %s372_s29 = scalar_lea.vmem %s20_s26, 64  ;;  %p377_p6 = scmp.lt.s32.totalorder %s20_s26, %s20_s26 }
  0x11   :  { %p373_p5 = scmp.ne.s32.totalorder %s20_s26, %s372_s29  ;;  %p378_p7 = scmp.lt.s32.totalorder %s372_s29, %s372_s29 }
  0x13   :  { %p379_p8 = por %p378_p7, %p377_p6 }
  0x15   :  { %p380_p9 = pnand %p379_p8, %p373_p5 }
  0x17   :  { %383 = shalt.err (!%p380_p9)
}
  0x18   :  { %22 = dma.hbm_to_vmem [thread:$0]  %s495_s0, 64, %s20_s26, [#allocation3]  }
  0x19   :  { %s392_s7 = scalar_lea.vmem %s41_s28, 1024  ;;  %p397_p11 = scmp.lt.s32.totalorder %s41_s28, %s41_s28 }
  0x1a   :  { %p393_p10 = scmp.ne.s32.totalorder %s41_s28, %s392_s7  ;;  %p398_p12 = scmp.lt.s32.totalorder %s392_s7, %s392_s7 }
  0x1c   :  { %p399_p13 = por %p398_p12, %p397_p11 }
  0x1e   :  { %p400_p0 = pnand %p399_p13, %p393_p10 }
  0x20   :  { %403 = shalt.err (!%p400_p0)
}
  0x21   :  { %46 = dma.hbm_to_vmem [thread:$0]  %s497_s2, 1024, %s41_s28, [#allocation6], %s431_s21, %s431_s21, %s432_s22  }
  0x22   :  { %424 = dma.done.wait [#allocation3], 64  }
  0x23   :  { %425 = vsyncadd [#allocation3], 4294967232 }
  0x24   :  { %426 = dma.done.wait [#allocation6], 2048  }
  0x25   :  { %427 = vsyncadd [#allocation6], 4294965248  ;;  %v435_v0 = vmov 0.0   ;;  %vm436_vm0 = vmmov 0   ;;  %v299_v1 = vld [vmem:[#allocation5 + $0x38] sm:$0xff]   ;;  %v298_v3 = vld [vmem:[#allocation5 + $0x30] sm:$0xff]  }
  0x26   :  { %316 = vmatprep.subr.bf16.mxu0 %v435_v0  ;;  %332 = vmatprep.mubr.msk.bf16.mxu0 %vm436_vm0, %v435_v0  ;;  %v306_v2 = vld [vmem:[#allocation7 + $0x38] sm:$0xff]   ;;  %v259_v4 = vunpack.c.l.bf16 %v299_v1  ;;  %v260_v5 = vunpack.c.h.bf16 %v299_v1  ;;  %v305_v8 = vld [vmem:[#allocation7 + $0x30] sm:$0xff]   ;;  %v297_v9 = vld [vmem:[#allocation5 + $0x28] sm:$0xff]   ;;  %v255_v11 = vunpack.c.l.bf16 %v298_v3  ;;  %v256_v12 = vunpack.c.h.bf16 %v298_v3  ;;  %s437_s11 = smov [#allocation8]  }
  0x27   :  { %v291_v6 = vunpack.c.l.bf16 %v306_v2  ;;  %v292_v7 = vunpack.c.h.bf16 %v306_v2  ;;  %v304_v10 = vld [vmem:[#allocation7 + $0x28] sm:$0xff]   ;;  %v287_v13 = vunpack.c.l.bf16 %v305_v8  ;;  %v288_v14 = vunpack.c.h.bf16 %v305_v8  ;;  %v296_v19 = vld [vmem:[#allocation5 + $0x20] sm:$0xff]   ;;  %v295_v33 = vld [vmem:[#allocation5 + $0x18] sm:$0xff]   ;;  %s219_s12 = sshll.u32 %s437_s11, 4  ;;  %s220_s12 = int_to_ptr.vmem [resolvable:$true] %s219_s12 }
  0x28   :  { %v251_v17 = vunpack.c.l.bf16 %v297_v9  ;;  %v252_v18 = vunpack.c.h.bf16 %v297_v9  ;;  %v303_v20 = vld [vmem:[#allocation7 + $0x20] sm:$0xff]   ;;  %v283_v23 = vunpack.c.l.bf16 %v304_v10  ;;  %v284_v24 = vunpack.c.h.bf16 %v304_v10  ;;  %v302_v34 = vld [vmem:[#allocation7 + $0x18] sm:$0xff]   ;;  %v294_v42 = vld [vmem:[#allocation5 + $0x10] sm:$0xff]   ;;  %s404_s13 = scalar_lea.vmem %s220_s12, 128  ;;  %p409_p2 = scmp.lt.s32.totalorder %s220_s12, %s220_s12 }
  0x29   :  { %v144_v15 = vadd.f32 %v291_v6, %v259_v4  ;;  %v145_v16 = vadd.f32 %v292_v7, %v260_v5  ;;  %v142_v21 = vadd.f32 %v287_v13, %v255_v11  ;;  %v143_v22 = vadd.f32 %v288_v14, %v256_v12  ;;  %v301_v43 = vld [vmem:[#allocation7 + $0x10] sm:$0xff]   ;;  %v293_v51 = vld [vmem:[#allocation5 + $0x8] sm:$0xff]   ;;  %v230_v60 = vld [vmem:[#allocation5] sm:$0xff]   ;;  %p405_p1 = scmp.ne.s32.totalorder %s220_s12, %s404_s13  ;;  %p410_p3 = scmp.lt.s32.totalorder %s404_s13, %s404_s13 }
  0x2a   :  { %v247_v26 = vunpack.c.l.bf16 %v296_v19  ;;  %v248_v27 = vunpack.c.h.bf16 %v296_v19  ;;  %v279_v28 = vunpack.c.l.bf16 %v303_v20  ;;  %v140_v30 = vadd.f32 %v283_v23, %v251_v17  ;;  %v300_v52 = vld [vmem:[#allocation7 + $0x8] sm:$0xff]   ;;  %v262_v61 = vld [vmem:[#allocation7] sm:$0xff]   ;;  %v147_v10 = vld [vmem:[#allocation2] sm:$0xf] }
  0x2b   :  { %v155_v25 = vpack.c.bf16 %v145_v16, %v144_v15  ;;  %v154_v29 = vpack.c.bf16 %v143_v22, %v142_v21  ;;  %v141_v31 = vadd.f32 %v284_v24, %v252_v18  ;;  %v280_v32 = vunpack.c.h.bf16 %v303_v20  ;;  %v202_v13 = vld [vmem:[%s498_s3] sm:$0x1]  ;;  %p411_p4 = por %p410_p3, %p409_p2 }
  0x2c   :  { %v138_v35 = vadd.f32 %v279_v28, %v247_v26  ;;  %v243_v36 = vunpack.c.l.bf16 %v295_v33  ;;  %v275_v37 = vunpack.c.l.bf16 %v302_v34  ;;  %v244_v40 = vunpack.c.h.bf16 %v295_v33  ;;  %v203_v14 = vld [vmem:[%s499_s4] sm:$0x1] }
  0x2d   :  { %317 = vmatpush3.bf16.msra.mxu0 %v155_v25  ;;  %v153_v38 = vpack.c.bf16 %v141_v31, %v140_v30  ;;  %v139_v39 = vadd.f32 %v280_v32, %v248_v27  ;;  %v276_v41 = vunpack.c.h.bf16 %v302_v34  ;;  %v239_v45 = vunpack.c.l.bf16 %v294_v42  ;;  %p412_p5 = pnand %p411_p4, %p405_p1 }
  0x2e   :  { %318 = vmatprep.subr.bf16.mxu0 %v435_v0  ;;  %v136_v44 = vadd.f32 %v275_v37, %v243_v36  ;;  %v271_v46 = vunpack.c.l.bf16 %v301_v43  ;;  %v240_v49 = vunpack.c.h.bf16 %v294_v42  ;;  %v272_v50 = vunpack.c.h.bf16 %v301_v43 }
  0x2f   :  { %v152_v47 = vpack.c.bf16 %v139_v39, %v138_v35  ;;  %v137_v48 = vadd.f32 %v276_v41, %v244_v40  ;;  %v235_v54 = vunpack.c.l.bf16 %v293_v51  ;;  %v236_v55 = vunpack.c.h.bf16 %v293_v51 }
  0x30   :  { %v134_v53 = vadd.f32 %v271_v46, %v239_v45  ;;  %v135_v57 = vadd.f32 %v272_v50, %v240_v49  ;;  %v267_v58 = vunpack.c.l.bf16 %v300_v52  ;;  %v268_v59 = vunpack.c.h.bf16 %v300_v52 }
  0x31   :  { %319 = vmatpush3.bf16.msra.mxu0 %v154_v29  ;;  %v151_v56 = vpack.c.bf16 %v137_v48, %v136_v44  ;;  %v231_v62 = vunpack.c.l.bf16 %v230_v60  ;;  %v232_v63 = vunpack.c.h.bf16 %v230_v60  ;;  %v263_v1 = vunpack.c.l.bf16 %v262_v61 }
  0x32   :  { %320 = vmatprep.subr.bf16.mxu0 %v435_v0  ;;  %v150_v2 = vpack.c.bf16 %v135_v57, %v134_v53  ;;  %v132_v3 = vadd.f32 %v267_v58, %v235_v54  ;;  %v133_v4 = vadd.f32 %v268_v59, %v236_v55  ;;  %v264_v5 = vunpack.c.h.bf16 %v262_v61 }
  0x33   :  { %v130_v7 = vadd.f32 %v263_v1, %v231_v62  ;;  %v206_v11 = vlaneseq  ;;  %v204_v15 = vadd.f32 %v203_v14, %v202_v13 }
  0x34   :  { %v149_v6 = vpack.c.bf16 %v133_v4, %v132_v3  ;;  %v131_v8 = vadd.f32 %v264_v5, %v232_v63 }
  0x35   :  { %321 = vmatpush3.bf16.msra.mxu0 %v153_v38  ;;  %v207_v12 = vshrl.u32 %v206_v11, 7 }
  0x36   :  { %322 = vmatprep.subr.bf16.mxu0 %v435_v0  ;;  %v148_v9 = vpack.c.bf16 %v131_v8, %v130_v7 }
  0x37   :  { %v208_v16 = vsub.s32 0, %v207_v12 }
  0x39   :  { %323 = vmatpush3.bf16.msra.mxu0 %v152_v47  ;;  %v209_v17 = vrot.slane %v204_v15, %v208_v16 }
  0x3a   :  { %324 = vmatprep.subr.bf16.mxu0 %v435_v0 }
  0x3d   :  { %325 = vmatpush3.bf16.msra.mxu0 %v151_v56 }
  0x3e   :  { %326 = vmatprep.subr.bf16.mxu0 %v435_v0 }
  0x41   :  { %327 = vmatpush3.bf16.msra.mxu0 %v150_v2 }
  0x42   :  { %328 = vmatprep.subr.bf16.mxu0 %v435_v0 }
  0x45   :  { %329 = vmatpush3.bf16.msra.mxu0 %v149_v6 }
  0x46   :  { %330 = vmatprep.subr.bf16.mxu0 %v435_v0 }
  0x49   :  { %331 = vmatpush3.bf16.msra.mxu0 %v148_v9 }
  0x4c   :  { %333 = vmatmul.mubr.bf16.vlgmr.msra.gmra.mxu0 %v147_v10 }
 0x10c   :  { %v190_v18 = vpop.f32.mrf.mxu0 }
 0x10d   :  { %v211_v19 = vadd.f32 %v209_v17, %v190_v18 }
 0x10e   :  { %v334_v0 = vpop.f32.mrf.mxu0 }
 0x10f   :  { %212 = vst [vmem:[#allocation8] sm:$0xff] %v211_v19 }
 0x110   :  { %v193_v20 = vpop.f32.mrf.mxu0 }
 0x112   :  { %v335_v21 = vpop.f32.mrf.mxu0 }
 0x113   :  { %415 = shalt.err (!%p412_p5)
}
 0x114   :  { %222 = dma.vmem_to_hbm [thread:$0]  %s220_s12, 128, %s500_s5, [#allocation4]  }
 0x115   :  { %428 = dma.done.wait [#allocation4], 128  }
 0x116   :  { %429 = vsyncadd [#allocation4], 4294967168 }
 0x117   :  { %226 = vsyncpa [#allocation3], 1 }
 0x118   :  { %227 = vsyncpa [#allocation6], 1 }
 0x119   :  { %228 = vsyncpa [#allocation4], 1 }

</bundles_post_ra>
